<compile_context>
chip_gen: v5e
topology: v5e:2x2
jax: 0.10.0
libtpu: 0.0.40
codegen_flags: <defaults>
</compile_context>

<pallas_src>
import jax
import jax.numpy as jnp
from jax import lax
from jax.experimental import pallas as pl
from jax.experimental.pallas import tpu as pltpu


def _mlp_kernel(x_ref, w1_ref, b1_ref, wh_ref, bh_ref, wp_ref, bp_ref,
                o_ref, h_ref):
    """One (batch_tile, stage) grid step.

    Stage 0           : h = relu(W1 @ x_tile.T + b1)        (first layer)
    Stage s in [1, L] : h = relu(Wh[s-1] @ h + bh[s-1])     (hidden layer)
    Stage L (== last) : out_row = sum_H(wp * h) + bp        (prediction head)
    h lives in a VMEM scratch with shape (H, batch_tile) (batch on lanes).
    """
    s = pl.program_id(1)
    last = pl.num_programs(1) - 1
    prec = lax.Precision.HIGHEST

    @pl.when(s == 0)
    def _first_layer():
        x_t = x_ref[...].astype(w1_ref.dtype)          # (bm, F)
        # (H, F) x (bm, F)^T -> (H, bm); rhs contracted on its feature axis.
        h = lax.dot_general(
            w1_ref[...], x_t,
            dimension_numbers=(((1,), (1,)), ((), ())),
            preferred_element_type=jnp.float32,
            precision=prec)
        h_ref[...] = jnp.maximum(h + b1_ref[...], 0.0)  # bias/ReLU in f32

    @pl.when(s > 0)
    def _hidden_layer():
        w = wh_ref[0]                                    # (H, H)
        h_in = h_ref[...].astype(w.dtype)                # (H, bm)
        h = jnp.dot(w, h_in,
                    preferred_element_type=jnp.float32,
                    precision=prec)
        h_ref[...] = jnp.maximum(h + bh_ref[0], 0.0)     # bh[0] is (H, 1)

    @pl.when(s == last)
    def _head():
        h = h_ref[...]                                   # (H, bm) f32
        wp_col = wp_ref[...].astype(jnp.float32)         # (H, 1)
        # N=1 matmul -> VPU mul + sublane reduce; result is lane-dense.
        out = jnp.sum(h * wp_col, axis=0, keepdims=True) # (1, bm)
        o_ref[...] = (out + bp_ref[...]).astype(o_ref.dtype)


def mlp_forward(x, params, *, block_batch=128, operand_dtype=None,
                vmem_limit_bytes=48 * 1024 * 1024):
    """x: (B, feature_dim) float32 -> (B, 1) float32.

    params (torch Linear layouts, i.e. weight = (out_features, in_features)):
      w1 (H, F), b1 (H, 1), wh (L, H, H), bh (L, H, 1), wp (H, 1), bp (1, 1).
    """
    w1, b1, wh, bh, wp, bp = params
    B, F = x.shape
    H = w1.shape[0]
    L = wh.shape[0]

    # Optional low-precision matmul operands (f32 accumulation in-kernel);
    # biases stay f32 so the elementwise path stays on the f32 VPU (v5e-safe).
    if operand_dtype is not None:
        x = x.astype(operand_dtype)
        w1 = w1.astype(operand_dtype)
        wh = wh.astype(operand_dtype)
        wp = wp.astype(operand_dtype)

    # L == 0: pad with one dummy (never-executed) hidden layer so the BlockSpec
    # over the layer axis never indexes a zero-length array.
    if L == 0:
        wh = jnp.zeros((1, H, H), w1.dtype)
        bh = jnp.zeros((1, H, 1), b1.dtype)

    bm = block_batch
    num_tiles = pl.cdiv(B, bm)
    b_pad = num_tiles * bm
    n_stages = L + 1                       # stage 0 = first layer, 1..L hidden

    def layer_idx(i, s):                   # clamp: stage 0 never uses wh/bh
        del i
        return (jnp.maximum(s - 1, 0), 0, 0)

    out_row = pl.pallas_call(
        _mlp_kernel,
        out_shape=jax.ShapeDtypeStruct((1, b_pad), jnp.float32),
        grid_spec=pltpu.PrefetchScalarGridSpec(
            num_scalar_prefetch=0,
            grid=(num_tiles, n_stages),
            in_specs=[
                pl.BlockSpec((bm, F), lambda i, s: (i, 0)),      # x tile
                pl.BlockSpec((H, F), lambda i, s: (0, 0)),       # W1 (resident)
                pl.BlockSpec((H, 1), lambda i, s: (0, 0)),       # b1 (resident)
                pl.BlockSpec((1, H, H), layer_idx),              # Wh[l] streamed
                pl.BlockSpec((1, H, 1), layer_idx),              # bh[l] streamed
                pl.BlockSpec((H, 1), lambda i, s: (0, 0)),       # Wp (resident)
                pl.BlockSpec((1, 1), lambda i, s: (0, 0)),       # bp (resident)
            ],
            out_specs=pl.BlockSpec((1, bm), lambda i, s: (0, i)),  # lane-dense
            scratch_shapes=[pltpu.VMEM((H, bm), jnp.float32)],     # carried h
        ),
        compiler_params=pltpu.CompilerParams(
            dimension_semantics=("parallel", "arbitrary"),
            vmem_limit_bytes=vmem_limit_bytes),
    )(x, w1, b1, wh, bh, wp, bp)

    # Layout plumbing only: drop padded lanes, restore the (B, 1) module shape.
    return out_row[0, :B].reshape(B, 1)


def init_params(key, feature_dim, hidden_dim, hidden_layer_num):
    """Deterministic synthetic parameters in torch-Linear layout."""
    ks = jax.random.split(key, 6)
    scale = 0.1
    L = max(hidden_layer_num, 1)  # keep RNG shapes valid even for L=0
    w1 = scale * jax.random.normal(ks[0], (hidden_dim, feature_dim), jnp.float32)
    b1 = scale * jax.random.normal(ks[1], (hidden_dim, 1), jnp.float32)
    wh = scale * jax.random.normal(ks[2], (L, hidden_dim, hidden_dim), jnp.float32)
    bh = scale * jax.random.normal(ks[3], (L, hidden_dim, 1), jnp.float32)
    wh = wh[:hidden_layer_num]
    bh = bh[:hidden_layer_num]
    wp = scale * jax.random.normal(ks[4], (hidden_dim, 1), jnp.float32)
    bp = scale * jax.random.normal(ks[5], (1, 1), jnp.float32)
    return w1, b1, wh, bh, wp, bp


def mlp_reference(x, params):
    """Pure-JAX reference matching the PyTorch forward (torch layouts)."""
    w1, b1, wh, bh, wp, bp = params
    hp = lax.Precision.HIGHEST
    h = jnp.maximum(jnp.dot(x, w1.T, precision=hp) + b1[:, 0], 0.0)
    for i in range(wh.shape[0]):
        h = jnp.maximum(jnp.dot(h, wh[i].T, precision=hp) + bh[i, :, 0], 0.0)
    return jnp.dot(h, wp, precision=hp) + bp


if __name__ == "__main__":
    feature_dim, hidden_dim, hidden_layer_num = 16, 32, 3
    batch = 256

    key = jax.random.PRNGKey(0)
    kx, kp = jax.random.split(key)
    x = jax.random.normal(kx, (batch, feature_dim), jnp.float32)
    params = init_params(kp, feature_dim, hidden_dim, hidden_layer_num)

    out = mlp_forward(x, params, block_batch=128)
    out = jax.block_until_ready(out)

    ref = mlp_reference(x, params)
    assert out.shape == (batch, 1), out.shape
    assert jnp.allclose(out, ref, atol=1e-4, rtol=1e-4), (
        float(jnp.max(jnp.abs(out - ref))))
    print("KERNEL_OK")
</pallas_src>

<mosaic_0001>
module attributes {stable_mosaic.version = 11 : i64} {
  func.func @_mlp_kernel(%arg0: i32, %arg1: i32, %arg2: memref<128x16xf32, #tpu.memory_space<vmem>>, %arg3: memref<32x16xf32, #tpu.memory_space<vmem>>, %arg4: memref<32x1xf32, #tpu.memory_space<vmem>>, %arg5: memref<1x32x32xf32, #tpu.memory_space<vmem>>, %arg6: memref<1x32x1xf32, #tpu.memory_space<vmem>>, %arg7: memref<32x1xf32, #tpu.memory_space<vmem>>, %arg8: memref<1x1xf32, #tpu.memory_space<vmem>>, %arg9: memref<1x128xf32, #tpu.memory_space<vmem>>, %arg10: memref<32x128xf32, #tpu.memory_space<vmem>>) attributes {dimension_semantics = [#tpu.dimension_semantics<parallel>, #tpu.dimension_semantics<arbitrary>], iteration_bounds = array<i64: 2, 4>, scalar_prefetch = 0 : i64, scratch_operands = 1 : i64, tpu.core_type = #tpu.core_type<tc>, window_params = [{transform_indices = @transform_0, window_bounds = array<i64: 128, 16>}, {pipeline_mode = #tpu.pipeline_mode<synchronous>, transform_indices = @transform_1, window_bounds = array<i64: 32, 16>}, {pipeline_mode = #tpu.pipeline_mode<synchronous>, transform_indices = @transform_2, window_bounds = array<i64: 32, 1>}, {transform_indices = @transform_3, window_bounds = array<i64: 1, 32, 32>}, {transform_indices = @transform_4, window_bounds = array<i64: 1, 32, 1>}, {pipeline_mode = #tpu.pipeline_mode<synchronous>, transform_indices = @transform_5, window_bounds = array<i64: 32, 1>}, {pipeline_mode = #tpu.pipeline_mode<synchronous>, transform_indices = @transform_6, window_bounds = array<i64: 1, 1>}, {transform_indices = @transform_7, window_bounds = array<i64: 1, 128>}]} {
    %c0_i32 = arith.constant 0 : i32
    %0 = arith.cmpi eq, %arg1, %c0_i32 : i32
    %1 = arith.extui %0 : i1 to i32
    %c0_i32_0 = arith.constant 0 : i32
    %2 = arith.cmpi ne, %1, %c0_i32_0 : i32
    scf.if %2 {
      %c0 = arith.constant 0 : index
      %c0_4 = arith.constant 0 : index
      %9 = vector.load %arg2[%c0, %c0_4] : memref<128x16xf32, #tpu.memory_space<vmem>>, vector<128x16xf32>
      %c0_5 = arith.constant 0 : index
      %c0_6 = arith.constant 0 : index
      %10 = vector.load %arg3[%c0_5, %c0_6] : memref<32x16xf32, #tpu.memory_space<vmem>>, vector<32x16xf32>
      %cst = arith.constant dense<0.000000e+00> : vector<32x128xf32>
      %11 = tpu.matmul %10, %9, %cst {dimension_numbers = #tpu.dot_dimension_numbers<[1], [1], [0], [0], [0, 0, 1, 0], [], []>, precision = #tpu.contract_precision<fp32>} : vector<32x16xf32>, vector<128x16xf32>, vector<32x128xf32> -> vector<32x128xf32>
      %c0_7 = arith.constant 0 : index
      %c0_8 = arith.constant 0 : index
      %12 = vector.load %arg4[%c0_7, %c0_8] : memref<32x1xf32, #tpu.memory_space<vmem>>, vector<32x1xf32>
      %13 = vector.broadcast %12 : vector<32x1xf32> to vector<32x128xf32>
      %14 = arith.addf %11, %13 : vector<32x128xf32>
      %cst_9 = arith.constant 0.000000e+00 : f32
      %15 = vector.broadcast %cst_9 : f32 to vector<32x128xf32>
      %16 = arith.maximumf %14, %15 : vector<32x128xf32>
      %c0_10 = arith.constant 0 : index
      %c0_11 = arith.constant 0 : index
      %17 = vector.load %arg10[%c0_10, %c0_11] : memref<32x128xf32, #tpu.memory_space<vmem>>, vector<32x128xf32>
      tpu.vector_store %arg10[%c0_10, %c0_11], %16 {strides = array<i32>} : memref<32x128xf32, #tpu.memory_space<vmem>>, vector<32x128xf32>,
    } else {
    }
    %c0_i32_1 = arith.constant 0 : i32
    %3 = arith.cmpi sgt, %arg1, %c0_i32_1 : i32
    %4 = arith.extui %3 : i1 to i32
    %c0_i32_2 = arith.constant 0 : i32
    %5 = arith.cmpi ne, %4, %c0_i32_2 : i32
    scf.if %5 {
      %c0 = arith.constant 0 : index
      %c0_4 = arith.constant 0 : index
      %c0_5 = arith.constant 0 : index
      %9 = vector.load %arg5[%c0, %c0_4, %c0_5] : memref<1x32x32xf32, #tpu.memory_space<vmem>>, vector<1x32x32xf32>
      %10 = vector.shape_cast %9 : vector<1x32x32xf32> to vector<32x32xf32>
      %c0_6 = arith.constant 0 : index
      %c0_7 = arith.constant 0 : index
      %11 = vector.load %arg10[%c0_6, %c0_7] : memref<32x128xf32, #tpu.memory_space<vmem>>, vector<32x128xf32>
      %cst = arith.constant dense<0.000000e+00> : vector<32x128xf32>
      %12 = tpu.matmul %10, %11, %cst {dimension_numbers = #tpu.dot_dimension_numbers<[1], [0], [0], [1], [0, 0, 1, 1], [], []>, precision = #tpu.contract_precision<fp32>} : vector<32x32xf32>, vector<32x128xf32>, vector<32x128xf32> -> vector<32x128xf32>
      %c0_8 = arith.constant 0 : index
      %c0_9 = arith.constant 0 : index
      %c0_10 = arith.constant 0 : index
      %13 = vector.load %arg6[%c0_8, %c0_9, %c0_10] : memref<1x32x1xf32, #tpu.memory_space<vmem>>, vector<1x32x1xf32>
      %14 = vector.shape_cast %13 : vector<1x32x1xf32> to vector<32x1xf32>
      %15 = vector.broadcast %14 : vector<32x1xf32> to vector<32x128xf32>
      %16 = arith.addf %12, %15 : vector<32x128xf32>
      %cst_11 = arith.constant 0.000000e+00 : f32
      %17 = vector.broadcast %cst_11 : f32 to vector<32x128xf32>
      %18 = arith.maximumf %16, %17 : vector<32x128xf32>
      %c0_12 = arith.constant 0 : index
      %c0_13 = arith.constant 0 : index
      %19 = vector.load %arg10[%c0_12, %c0_13] : memref<32x128xf32, #tpu.memory_space<vmem>>, vector<32x128xf32>
      tpu.vector_store %arg10[%c0_12, %c0_13], %18 {strides = array<i32>} : memref<32x128xf32, #tpu.memory_space<vmem>>, vector<32x128xf32>,
    } else {
    }
    %c3_i32 = arith.constant 3 : i32
    %6 = arith.cmpi eq, %arg1, %c3_i32 : i32
    %7 = arith.extui %6 : i1 to i32
    %c0_i32_3 = arith.constant 0 : i32
    %8 = arith.cmpi ne, %7, %c0_i32_3 : i32
    scf.if %8 {
      %c0 = arith.constant 0 : index
      %c0_4 = arith.constant 0 : index
      %9 = vector.load %arg10[%c0, %c0_4] : memref<32x128xf32, #tpu.memory_space<vmem>>, vector<32x128xf32>
      %c0_5 = arith.constant 0 : index
      %c0_6 = arith.constant 0 : index
      %10 = vector.load %arg7[%c0_5, %c0_6] : memref<32x1xf32, #tpu.memory_space<vmem>>, vector<32x1xf32>
      %11 = vector.broadcast %10 : vector<32x1xf32> to vector<32x128xf32>
      %12 = arith.mulf %9, %11 : vector<32x128xf32>
      %cst = arith.constant dense<0.000000e+00> : vector<128xf32>
      %13 = vector.multi_reduction <add>, %12, %cst [0] : vector<32x128xf32> to vector<128xf32>
      %14 = vector.shape_cast %13 : vector<128xf32> to vector<1x128xf32>
      %c0_7 = arith.constant 0 : index
      %c0_8 = arith.constant 0 : index
      %15 = vector.load %arg8[%c0_7, %c0_8] : memref<1x1xf32, #tpu.memory_space<vmem>>, vector<1x1xf32>
      %16 = vector.broadcast %15 : vector<1x1xf32> to vector<1x128xf32>
      %17 = arith.addf %14, %16 : vector<1x128xf32>
      %c0_9 = arith.constant 0 : index
      %c0_10 = arith.constant 0 : index
      %18 = vector.load %arg9[%c0_9, %c0_10] : memref<1x128xf32, #tpu.memory_space<vmem>>, vector<1x128xf32>
      tpu.vector_store %arg9[%c0_9, %c0_10], %17 {strides = array<i32>} : memref<1x128xf32, #tpu.memory_space<vmem>>, vector<1x128xf32>,
    } else {
    }
    return
  }
  func.func @transform_0(%arg0: i32, %arg1: i32) -> (i32, i32) {
    %c0_i32 = arith.constant 0 : i32
    %c0_i32_0 = arith.constant 0 : i32
    return %arg0, %c0_i32 : i32, i32
  }
  func.func @transform_1(%arg0: i32, %arg1: i32) -> (i32, i32) {
    %c0_i32 = arith.constant 0 : i32
    %c0_i32_0 = arith.constant 0 : i32
    %c0_i32_1 = arith.constant 0 : i32
    return %c0_i32, %c0_i32_0 : i32, i32
  }
  func.func @transform_2(%arg0: i32, %arg1: i32) -> (i32, i32) {
    %c0_i32 = arith.constant 0 : i32
    %c0_i32_0 = arith.constant 0 : i32
    %c0_i32_1 = arith.constant 0 : i32
    return %c0_i32, %c0_i32_0 : i32, i32
  }
  func.func @transform_3(%arg0: i32, %arg1: i32) -> (i32, i32, i32) {
    %c1_i32 = arith.constant 1 : i32
    %0 = arith.subi %arg1, %c1_i32 : i32
    %c0_i32 = arith.constant 0 : i32
    %1 = arith.maxsi %0, %c0_i32 : i32
    %c0_i32_0 = arith.constant 0 : i32
    %c0_i32_1 = arith.constant 0 : i32
    %c0_i32_2 = arith.constant 0 : i32
    return %1, %c0_i32_0, %c0_i32_1 : i32, i32, i32
  }
  func.func @transform_4(%arg0: i32, %arg1: i32) -> (i32, i32, i32) {
    %c1_i32 = arith.constant 1 : i32
    %0 = arith.subi %arg1, %c1_i32 : i32
    %c0_i32 = arith.constant 0 : i32
    %1 = arith.maxsi %0, %c0_i32 : i32
    %c0_i32_0 = arith.constant 0 : i32
    %c0_i32_1 = arith.constant 0 : i32
    %c0_i32_2 = arith.constant 0 : i32
    return %1, %c0_i32_0, %c0_i32_1 : i32, i32, i32
  }
  func.func @transform_5(%arg0: i32, %arg1: i32) -> (i32, i32) {
    %c0_i32 = arith.constant 0 : i32
    %c0_i32_0 = arith.constant 0 : i32
    %c0_i32_1 = arith.constant 0 : i32
    return %c0_i32, %c0_i32_0 : i32, i32
  }
  func.func @transform_6(%arg0: i32, %arg1: i32) -> (i32, i32) {
    %c0_i32 = arith.constant 0 : i32
    %c0_i32_0 = arith.constant 0 : i32
    %c0_i32_1 = arith.constant 0 : i32
    return %c0_i32, %c0_i32_0 : i32, i32
  }
  func.func @transform_7(%arg0: i32, %arg1: i32) -> (i32, i32) {
    %c0_i32 = arith.constant 0 : i32
    %c0_i32_0 = arith.constant 0 : i32
    return %c0_i32, %arg0 : i32, i32
  }
}

</mosaic_0001>

<bundles_post_ra>
// kernel: tpu_custom_call.1
= control target key start
LH: loop header
LB: loop body
LE: loop exit
PB: predicated region body
PF: predicated region fallthrough
CT: control target
= control target key end

     0   :  { %s2229_s0 = inlined_call_operand.vmem [shape: f32[256,16], index: 0, kind: input, shape index: {}]   ;;  %s2230_s1 = inlined_call_operand.vmem [shape: f32[32,16], index: 1, kind: input, shape index: {}]   ;;  %s2231_s2 = inlined_call_operand.vmem [shape: f32[32,1], index: 2, kind: input, shape index: {}]   ;;  %s2232_s3 = inlined_call_operand.vmem [shape: f32[3,32,32], index: 3, kind: input, shape index: {}]   ;;  %s2233_s4 = inlined_call_operand.vmem [shape: f32[3,32,1], index: 4, kind: input, shape index: {}]   ;;  %s2234_s5 = inlined_call_operand.vmem [shape: f32[32,1], index: 5, kind: input, shape index: {}]   ;;  %s2235_s6 = inlined_call_operand.<no memory space> [shape: f32[1,1], index: 6, kind: input, shape index: {}]   ;;  %s2236_s7 = inlined_call_operand.hbm [shape: f32[1,256], index: 7, kind: output, shape index: {}]  }
   0x1   :  { %v12_v0 = vstv %s2235_s6 }
   0x2   :  { %13 = vst [vmem:[#allocation3] sm:$0x1] %v12_v0 }
   0x3   :  { %14 = vsyncpa [#allocation5], 0 }
   0x4   :  { %16 = vsyncpa [#allocation5 + $0x1], 0  ;;  %s1718_s26 = smov 0   ;;  %s1720_s27 = smov 0  }
   0x5   :  { %s1722_s28 = smov 0   ;;  %s1724_s29 = smov 0  }
   0x6   :  { %s1726_s30 = smov 0   ;;  %s1728_s8 = smov 0  }
   0x7   :  { %s1730_s9 = smov 0   ;;  %s1732_s10 = smov 0  }
   0x8 LB: > { %2239 = sst [smem:[#allocation7_spill]] %s1666_s9  ;;  %s1417_s6 = sadd.s32 4294967295, %s1670_s10   ;;  %s1670_s10 = sphi %s1732_s10, %s22_s10   ;;  %s1666_s9 = sphi %s1730_s9, %s2248_s9   ;;  %s1662_s8 = sphi %s1728_s8, %s2253_s8   ;;  %s1658_s30 = sphi %s1726_s30, %s2246_s30   ;;  %s1654_s29 = sphi %s1724_s29, %s2252_s29   ;;  %s1650_s28 = sphi %s1722_s28, %s2251_s28   ;;  %s1646_s27 = sphi %s1720_s27, %s2250_s27   ;;  %s1642_s26 = sphi %s1718_s26, %s2249_s26  }
   0x9   : > { %s1418_s11 = sadd.s32 4294967294, %s1670_s10   ;;  %s31_s12 = sadd.s32 1, %s1662_s8 }
   0xa   : > { %p32_p0 = scmp.ge.s32.totalorder %s31_s12, 4  ;;  %s34_s13 = sadd.s32 1, %s1666_s9 }
   0xb   : > { %p225_p1 = scmp.ne.s32.totalorder %s1650_s28, %s1646_s27  ;;  %p226_p2 = scmp.eq.s32.totalorder %s1417_s6, 7 }
   0xc   : > { %s2255_s12 = smov (%p32_p0, %s31_s12), 0  ;;  %s2257_s13 = smov (!%p32_p0, %s34_s13), %s1666_s9 }
   0xd   : > { %2240 = sst [smem:[#allocation8_spill]] %s2255_s12  ;;  %p1767_p3 = por %p226_p2, %p225_p1 }
   0xe   : > { %p231_p4 = scmp.ne.s32.totalorder %s1646_s27, %s1642_s26  ;;  %p36_p5 = scmp.ge.s32.totalorder %s2257_s13, 2 }
   0xf   : > { %p232_p6 = scmp.eq.s32.totalorder %s1418_s11, 7  ;;  %p1425_p7 = scmp.ge.s32.totalorder %s1670_s10, 1 }
  0x10   : > { %p299_p8 = scmp.lt.s32.totalorder %s1670_s10, 9  ;;  %s2259_s13 = smov (%p36_p5, %s2257_s13), 0 }
  0x11   : > { %2242 = sst [smem:[#allocation9_spill]] %s2259_s13  ;;  %p1777_p9 = por %p232_p6, %p231_p4 }
  0x12   : > { %p300_p10 = pnand %p1425_p7, %p299_p8  ;;  %s212_s16 = ssub.s32 %s1666_s9, %s2259_s13 }
  0x13   : > { %s215_s17 = sadd.s32 1, %s1650_s28  ;;  %p213_p11 = scmp.eq.s32.totalorder %s212_s16, 0 }
  0x14   : > { %303 = sbr.rel (%p300_p10) target bundleno = 690 (0x2b2), region = 48  ;;  %s1426_s20 = sshll.u32 (!%p300_p10), %s1658_s30, 4 }
  0x15   : > { %s1785_s18 = scalar_select %p213_p11, %s1650_s28, %s215_s17  }
  0x16   : > { %p347_p12 = scmp.lt.s32.totalorder (!%p300_p10), %s1426_s20, 31  ;;  %s1428_s21 = sadd.s32 (!%p300_p10), 4294967295, %s1654_s29 }
  0x17   : > { %p353_p13 = scmp.gt.s32.totalorder (!%p300_p10), %s1428_s21, 0  ;;  %p1429_p0 = scmp.lt.s32.totalorder (!%p300_p10), %s1428_s21, 2 }
  0x18   : > { %p1444_p1 = scmp.ne.s32.totalorder (!%p300_p10), %s1654_s29, 0 }
  0x19   : > { %s2261_s20 = smov (!%p347_p12, %s1426_s20), 31  ;;  %s2263_s21 = smov (!%p353_p13, %s1428_s21), 0 }
  0x1a   : > { %s1427_s22 = sshll.u32 %s2261_s20, 3  ;;  %s2265_s21 = smov (!%p1429_p0, %s2263_s21), 2 }
  0x1b   : > { %s1793_s25 = scalar_lea.vmem %s2229_s0, %s1427_s22  ;;  %s1451_s6 = sshll.u32 %s2265_s21, 5 }
  0x1c   : > { %s1798_s17 = scalar_lea.vmem %s2232_s3, %s1451_s6  ;;  %s1803_s12 = scalar_lea.vmem %s2233_s4, %s1451_s6 }
  0x1d   : > { %s2244_s20 = sand.u32 1, %s1646_s27   ;;  %377 = sbr.rel (%p1444_p1) target bundleno = 314 (0x13a), region = 52 }
  0x1e   : > { %s1807_s9 = scalar_lea.vmem [#allocation4], %s2244_s20 }
  0x22   : > { %v393_v1 = vld [vmem:[%s1793_s25 + $0x78] sm:$0xff]  ;;  %vm422_vm0 = vcmask 130048   ;;  %v392_v2 = vld [vmem:[%s1793_s25 + $0x70] sm:$0xff]  ;;  %v391_v3 = vld [vmem:[%s1793_s25 + $0x68] sm:$0xff] }
  0x23   : > { %v481_v4 = vsel %vm422_vm0, %v393_v1, 0  ;;  %v478_v5 = vsel %vm422_vm0, %v392_v2, 0  ;;  %v475_v6 = vsel %vm422_vm0, %v391_v3, 0  ;;  %v390_v7 = vld [vmem:[%s1793_s25 + $0x60] sm:$0xff]  ;;  %v389_v8 = vld [vmem:[%s1793_s25 + $0x58] sm:$0xff]  ;;  %v388_v18 = vld [vmem:[%s1793_s25 + $0x50] sm:$0xff] }
  0x24   : > { %v1818_v9 = vand.u32 4294901760, %v481_v4  ;;  %v1820_v10 = vand.u32 4294901760, %v478_v5  ;;  %v1822_v11 = vand.u32 4294901760, %v475_v6  ;;  %v472_v12 = vsel %vm422_vm0, %v390_v7, 0  ;;  %v387_v27 = vld [vmem:[%s1793_s25 + $0x48] sm:$0xff]  ;;  %v386_v35 = vld [vmem:[%s1793_s25 + $0x40] sm:$0xff] }
  0x25   : > { %v1825_v13 = vand.u32 4294901760, %v472_v12  ;;  %v469_v17 = vsel %vm422_vm0, %v389_v8, 0  ;;  %v466_v22 = vsel %vm422_vm0, %v388_v18, 0  ;;  %v463_v30 = vsel %vm422_vm0, %v387_v27, 0  ;;  %v385_v42 = vld [vmem:[%s1793_s25 + $0x38] sm:$0xff]  ;;  %v384_v49 = vld [vmem:[%s1793_s25 + $0x30] sm:$0xff] }
  0x26   : > { %484 = vmatpush.xpose.msra.mxu0 %v1818_v9  ;;  %v549_v14 = vsub.f32 %v481_v4, %v1818_v9  ;;  %731 = vmatpush.xpose.msra.mxu3 %v1818_v9  ;;  %v555_v15 = vsub.f32 %v478_v5, %v1820_v10  ;;  %v561_v16 = vsub.f32 %v475_v6, %v1822_v11  ;;  %v1838_v21 = vand.u32 4294901760, %v469_v17  ;;  %v383_v55 = vld [vmem:[%s1793_s25 + $0x28] sm:$0xff]  ;;  %v382_v63 = vld [vmem:[%s1793_s25 + $0x20] sm:$0xff]  ;;  %v381_v6 = vld [vmem:[%s1793_s25 + $0x18] sm:$0xff] }
  0x27   : > { %v567_v25 = vsub.f32 %v472_v12, %v1825_v13  ;;  %v1849_v29 = vand.u32 4294901760, %v466_v22  ;;  %v1859_v36 = vand.u32 4294901760, %v463_v30  ;;  %v460_v37 = vsel %vm422_vm0, %v386_v35, 0 }
  0x28   : > { %663 = vmatpush.xpose.msra.mxu2 %v549_v14  ;;  %v1834_v19 = vand.u32 4294901760, %v549_v14  ;;  %v1836_v20 = vand.u32 4294901760, %v555_v15  ;;  %v1846_v26 = vand.u32 4294901760, %v561_v16  ;;  %v573_v33 = vsub.f32 %v469_v17, %v1838_v21  ;;  %v380_v17 = vld [vmem:[%s1793_s25 + $0x10] sm:$0xff] }
  0x29   : > { %v1855_v34 = vand.u32 4294901760, %v567_v25  ;;  %v579_v40 = vsub.f32 %v466_v22, %v1849_v29  ;;  %v1869_v43 = vand.u32 4294901760, %v460_v37  ;;  %v585_v46 = vsub.f32 %v463_v30, %v1859_v36 }
  0x2a   : > { %486 = vmatpush.xpose.msra.mxu0 %v1820_v10  ;;  %v551_v23 = vsub.f32 %v549_v14, %v1834_v19  ;;  %733 = vmatpush.xpose.msra.mxu3 %v1820_v10  ;;  %v557_v24 = vsub.f32 %v555_v15, %v1836_v20  ;;  %v563_v32 = vsub.f32 %v561_v16, %v1846_v26  ;;  %v1865_v41 = vand.u32 4294901760, %v573_v33 }
  0x2b   : > { %v569_v39 = vsub.f32 %v567_v25, %v1855_v34  ;;  %v1874_v47 = vand.u32 4294901760, %v579_v40  ;;  %v457_v48 = vsel %vm422_vm0, %v385_v42, 0  ;;  %v591_v50 = vsub.f32 %v460_v37, %v1869_v43 }
  0x2c   : > { %666 = vmatpush.xpose.msra.mxu2 %v555_v15  ;;  %v552_v28 = vand.u32 4294901760, %v551_v23  ;;  %v558_v31 = vand.u32 4294901760, %v557_v24  ;;  %v564_v38 = vand.u32 4294901760, %v563_v32  ;;  %v575_v45 = vsub.f32 %v573_v33, %v1865_v41 }
  0x2d   : > { %v570_v44 = vand.u32 4294901760, %v569_v39  ;;  %v581_v52 = vsub.f32 %v579_v40, %v1874_v47  ;;  %v1882_v53 = vand.u32 4294901760, %v457_v48  ;;  %v1884_v54 = vand.u32 4294901760, %v585_v46 }
  0x2e   : > { %488 = vmatpush.xpose.msra.mxu0 %v1822_v11  ;;  %553 = vmatpush.xpose.msra.mxu1 %v552_v28  ;;  %v576_v51 = vand.u32 4294901760, %v575_v45  ;;  %v454_v56 = vsel %vm422_vm0, %v384_v49, 0  ;;  %v1889_v57 = vand.u32 4294901760, %v591_v50  ;;  %v451_v58 = vsel %vm422_vm0, %v383_v55, 0  ;;  %v379_v28 = vld [vmem:[%s1793_s25 + $0x8] sm:$0xff]  ;;  %v394_v55 = vld [vmem:[%s2230_s1] sm:$0xff] }
  0x2f   : > { %735 = vmatpush.xpose.msra.mxu3 %v1822_v11  ;;  %v582_v59 = vand.u32 4294901760, %v581_v52  ;;  %v587_v60 = vsub.f32 %v585_v46, %v1884_v54  ;;  %v597_v61 = vsub.f32 %v457_v48, %v1882_v53  ;;  %v1895_v62 = vand.u32 4294901760, %v454_v56 }
  0x30   : > { %669 = vmatpush.xpose.msra.mxu2 %v561_v16  ;;  %v593_v0 = vsub.f32 %v591_v50, %v1889_v57  ;;  %v1900_v1 = vand.u32 4294901760, %v451_v58  ;;  %v448_v5 = vsel %vm422_vm0, %v382_v63, 0  ;;  %v445_v16 = vsel %vm422_vm0, %v381_v6, 0 }
  0x31   : > { %v588_v2 = vand.u32 4294901760, %v587_v60  ;;  %v603_v3 = vsub.f32 %v454_v56, %v1895_v62  ;;  %v1904_v4 = vand.u32 4294901760, %v597_v61  ;;  %v1909_v8 = vand.u32 4294901760, %v448_v5 }
  0x32   : > { %490 = vmatpush.xpose.msra.mxu0 %v1825_v13  ;;  %559 = vmatpush.xpose.msra.mxu1 %v558_v31  ;;  %v594_v7 = vand.u32 4294901760, %v593_v0  ;;  %v609_v14 = vsub.f32 %v451_v58, %v1900_v1  ;;  %v1919_v18 = vand.u32 4294901760, %v445_v16  ;;  %v442_v27 = vsel %vm422_vm0, %v380_v17, 0 }
  0x33   : > { %737 = vmatpush.xpose.msra.mxu3 %v1825_v13  ;;  %v599_v12 = vsub.f32 %v597_v61, %v1904_v4  ;;  %v1914_v15 = vand.u32 4294901760, %v603_v3  ;;  %v615_v24 = vsub.f32 %v448_v5, %v1909_v8  ;;  %v439_v37 = vsel %vm422_vm0, %v379_v28, 0 }
  0x34   : > { %672 = vmatpush.xpose.msra.mxu2 %v567_v25  ;;  %v1924_v25 = vand.u32 4294901760, %v609_v14  ;;  %v621_v30 = vsub.f32 %v445_v16, %v1919_v18  ;;  %v1944_v45 = vand.u32 4294901760, %v439_v37  ;;  %v424_v56 = vsel %vm422_vm0, %v394_v55, 0 }
  0x35   : > { %v600_v22 = vand.u32 4294901760, %v599_v12  ;;  %v605_v23 = vsub.f32 %v603_v3, %v1914_v15  ;;  %v1934_v35 = vand.u32 4294901760, %v615_v24  ;;  %v1960_v58 = vand.u32 4294901760, %v424_v56  ;;  %v395_v12 = vld [vmem:[%s2230_s1 + $0x8] sm:$0xff] }
  0x36   : > { %492 = vmatpush.xpose.msra.mxu0 %v1838_v21  ;;  %565 = vmatpush.xpose.msra.mxu1 %v564_v38  ;;  %v611_v32 = vsub.f32 %v609_v14, %v1924_v25  ;;  %v378_v38 = vld [vmem:[%s1793_s25] sm:$0xff]  ;;  %v1939_v39 = vand.u32 4294901760, %v621_v30 }
  0x37   : > { %739 = vmatpush.xpose.msra.mxu3 %v1838_v21  ;;  %v606_v31 = vand.u32 4294901760, %v605_v23  ;;  %v617_v42 = vsub.f32 %v615_v24, %v1934_v35  ;;  %v516_v0 = vsub.f32 %v424_v56, %v1960_v58 }
  0x38   : > { %675 = vmatpush.xpose.msra.mxu2 %v573_v33  ;;  %v1932_v33 = vand.u32 4294901760, %v442_v27  ;;  %v623_v48 = vsub.f32 %v621_v30, %v1939_v39 }
  0x39   : > { %v618_v49 = vand.u32 4294901760, %v617_v42 }
  0x3a   : > { %494 = vmatpush.xpose.msra.mxu0 %v1849_v29  ;;  %571 = vmatpush.xpose.msra.mxu1 %v570_v44  ;;  %v627_v44 = vsub.f32 %v442_v27, %v1932_v33 }
  0x3b   : > { %741 = vmatpush.xpose.msra.mxu3 %v1849_v29 }
  0x3c   : > { %678 = vmatpush.xpose.msra.mxu2 %v579_v40  ;;  %v612_v40 = vand.u32 4294901760, %v611_v32  ;;  %v1953_v52 = vand.u32 4294901760, %v627_v44 }
  0x3e   : > { %496 = vmatpush.xpose.msra.mxu0 %v1859_v36  ;;  %577 = vmatpush.xpose.msra.mxu1 %v576_v51  ;;  %v629_v60 = vsub.f32 %v627_v44, %v1953_v52 }
  0x3f   : > { %743 = vmatpush.xpose.msra.mxu3 %v1859_v36 }
  0x40   : > { %681 = vmatpush.xpose.msra.mxu2 %v585_v46  ;;  %v436_v46 = vsel %vm422_vm0, %v378_v38, 0 }
  0x41   : > { %v1951_v51 = vand.u32 4294901760, %v436_v46 }
  0x42   : > { %498 = vmatpush.xpose.msra.mxu0 %v1869_v43  ;;  %583 = vmatpush.xpose.msra.mxu1 %v582_v59  ;;  %v624_v59 = vand.u32 4294901760, %v623_v48 }
  0x43   : > { %745 = vmatpush.xpose.msra.mxu3 %v1869_v43 }
  0x44   : > { %684 = vmatpush.xpose.msra.mxu2 %v591_v50  ;;  %v633_v50 = vsub.f32 %v439_v37, %v1944_v45 }
  0x46   : > { %500 = vmatpush.xpose.msra.mxu0 %v1882_v53  ;;  %589 = vmatpush.xpose.msra.mxu1 %v588_v2  ;;  %v1965_v63 = vand.u32 4294901760, %v633_v50  ;;  %v517_v2 = vand.u32 4294901760, %v516_v0 }
  0x47   : > { %747 = vmatpush.xpose.msra.mxu3 %v1882_v53 }
  0x48   : > { %687 = vmatpush.xpose.msra.mxu2 %v597_v61  ;;  %v639_v61 = vsub.f32 %v436_v46, %v1951_v51  ;;  %v635_v5 = vsub.f32 %v633_v50, %v1965_v63  ;;  %v1672_v46 = vmov 0  }
  0x49   : > { %1569 = vset.pattern.permute.xlu0 %v1672_v46  ;;  %1570 = vset.pattern.permute.xlu1 %v1672_v46 }
  0x4a   : > { %502 = vmatpush.xpose.msra.mxu0 %v1895_v62  ;;  %595 = vmatpush.xpose.msra.mxu1 %v594_v7  ;;  %v1971_v6 = vand.u32 4294901760, %v639_v61  ;;  %v518_v7 = vsub.f32 %v516_v0, %v517_v2 }
  0x4b   : > { %749 = vmatpush.xpose.msra.mxu3 %v1895_v62 }
  0x4c   : > { %690 = vmatpush.xpose.msra.mxu2 %v603_v3  ;;  %v630_v3 = vand.u32 4294901760, %v629_v60  ;;  %v519_v17 = vand.u32 4294901760, %v518_v7  ;;  %v641_v23 = vsub.f32 %v639_v61, %v1971_v6 }
  0x4e   : > { %504 = vmatpush.xpose.msra.mxu0 %v1900_v1  ;;  %601 = vmatpush.xpose.msra.mxu1 %v600_v22  ;;  %v636_v22 = vand.u32 4294901760, %v635_v5  ;;  %v642_v28 = vand.u32 4294901760, %v641_v23 }
  0x4f   : > { %751 = vmatpush.xpose.msra.mxu3 %v1900_v1 }
  0x50   : > { %693 = vmatpush.xpose.msra.mxu2 %v609_v14  ;;  %v427_v14 = vsel %vm422_vm0, %v395_v12, 0 }
  0x51   : > { %v1978_v16 = vand.u32 4294901760, %v427_v14 }
  0x52   : > { %506 = vmatpush.xpose.msra.mxu0 %v1909_v8  ;;  %607 = vmatpush.xpose.msra.mxu1 %v606_v31  ;;  %v396_v31 = vld [vmem:[%s2230_s1 + $0x10] sm:$0xff] }
  0x53   : > { %753 = vmatpush.xpose.msra.mxu3 %v1909_v8  ;;  %v430_v32 = vsel %vm422_vm0, %v396_v31, 0 }
  0x54   : > { %696 = vmatpush.xpose.msra.mxu2 %v615_v24  ;;  %v524_v24 = vsub.f32 %v427_v14, %v1978_v16  ;;  %v1993_v37 = vand.u32 4294901760, %v430_v32 }
  0x56   : > { %508 = vmatpush.xpose.msra.mxu0 %v1919_v18  ;;  %613 = vmatpush.xpose.msra.mxu1 %v612_v40  ;;  %v525_v27 = vand.u32 4294901760, %v524_v24  ;;  %v532_v38 = vsub.f32 %v430_v32, %v1993_v37 }
  0x57   : > { %755 = vmatpush.xpose.msra.mxu3 %v1919_v18 }
  0x58   : > { %699 = vmatpush.xpose.msra.mxu2 %v621_v30  ;;  %v526_v30 = vsub.f32 %v524_v24, %v525_v27  ;;  %v533_v40 = vand.u32 4294901760, %v532_v38 }
  0x5a   : > { %510 = vmatpush.xpose.msra.mxu0 %v1932_v33  ;;  %619 = vmatpush.xpose.msra.mxu1 %v618_v49  ;;  %v534_v42 = vsub.f32 %v532_v38, %v533_v40 }
  0x5b   : > { %757 = vmatpush.xpose.msra.mxu3 %v1932_v33 }
  0x5c   : > { %702 = vmatpush.xpose.msra.mxu2 %v627_v44  ;;  %v535_v48 = vand.u32 4294901760, %v534_v42 }
  0x5e   : > { %512 = vmatpush.xpose.msra.mxu0 %v1944_v45  ;;  %625 = vmatpush.xpose.msra.mxu1 %v624_v59 }
  0x5f   : > { %759 = vmatpush.xpose.msra.mxu3 %v1944_v45 }
  0x60   : > { %705 = vmatpush.xpose.msra.mxu2 %v633_v50  ;;  %v399_v50 = vld [vmem:[%s2231_s2 + $0x8] sm:$0xff] }
  0x62   : > { %514 = vmatpush.xpose.msra.mxu0 %v1951_v51  ;;  %631 = vmatpush.xpose.msra.mxu1 %v630_v3 }
  0x63   : > { %761 = vmatpush.xpose.msra.mxu3 %v1951_v51 }
  0x64   : > { %708 = vmatpush.xpose.msra.mxu2 %v639_v61 }
  0x65   : > { %520 = vmatmul.f32.vlgmr.msra.gmra.mxu0 %v519_v17 }
  0x66   : > { %790 = vmatpush.xpose.msrb.mxu0 %v1834_v19  ;;  %637 = vmatpush.xpose.msra.mxu1 %v636_v22 }
  0x67   : > { %1471 = vmatpush.xpose.msrb.mxu3 %v1818_v9  ;;  %711 = vmatmul.f32.vlgmr.msra.gmra.mxu2 %v516_v0 }
  0x68   : > { %1455 = vmatpush.xpose.msrb.mxu2 %v1834_v19  ;;  %765 = vmatmul.f32.vlgmr.msra.gmra.mxu3 %v517_v2  ;;  %v527_v19 = vand.u32 4294901760, %v526_v30 }
  0x6a   : > { %794 = vmatpush.xpose.msrb.mxu0 %v1836_v20  ;;  %643 = vmatpush.xpose.msra.mxu1 %v642_v28 }
  0x6b   : > { %1472 = vmatpush.xpose.msrb.mxu3 %v1820_v10 }
  0x6c   : > { %1456 = vmatpush.xpose.msrb.mxu2 %v1836_v20  ;;  %v397_v20 = vld [vmem:[%s2230_s1 + $0x18] sm:$0xff] }
  0x6d   : > { %645 = vmatmul.f32.vlgmr.msra.gmra.mxu1 %v1960_v58  ;;  %528 = vmatmul.f32.gmra.mxu0 %v527_v19  ;;  %v433_v44 = vsel %vm422_vm0, %v397_v20, 0 }
  0x6e   : > { %798 = vmatpush.xpose.msrb.mxu0 %v1846_v26  ;;  %869 = vmatpush.xpose.msrb.mxu1 %v1818_v9  ;;  %v398_v9 = vld [vmem:[%s2231_s2] sm:$0xff] }
  0x6f   : > { %1473 = vmatpush.xpose.msrb.mxu3 %v1822_v11  ;;  %716 = vmatmul.f32.gmra.mxu2 %v524_v24 }
  0x70   : > { %1457 = vmatpush.xpose.msrb.mxu2 %v1846_v26  ;;  %771 = vmatmul.f32.gmra.mxu3 %v525_v27  ;;  %v2012_v26 = vand.u32 4294901760, %v433_v44 }
  0x71   : > { %404 = vperm.xlu0 %1569, %v398_v9  }
  0x72   : > { %802 = vmatpush.xpose.msrb.mxu0 %v1855_v34  ;;  %871 = vmatpush.xpose.msrb.mxu1 %v1820_v10  ;;  %v540_v49 = vsub.f32 %v433_v44, %v2012_v26 }
  0x73   : > { %1474 = vmatpush.xpose.msrb.mxu3 %v1825_v13 }
  0x74   : > { %1458 = vmatpush.xpose.msrb.mxu2 %v1855_v34  ;;  %v541_v10 = vand.u32 4294901760, %v540_v49 }
  0x75   : > { %649 = vmatmul.f32.gmra.mxu1 %v1978_v16  ;;  %536 = vmatmul.f32.gmra.mxu0 %v535_v48 }
  0x76   : > { %806 = vmatpush.xpose.msrb.mxu0 %v1865_v41  ;;  %873 = vmatpush.xpose.msrb.mxu1 %v1822_v11  ;;  %v542_v34 = vsub.f32 %v540_v49, %v541_v10 }
  0x77   : > { %1475 = vmatpush.xpose.msrb.mxu3 %v1838_v21  ;;  %721 = vmatmul.f32.gmra.mxu2 %v532_v38 }
  0x78   : > { %1459 = vmatpush.xpose.msrb.mxu2 %v1865_v41  ;;  %777 = vmatmul.f32.gmra.mxu3 %v533_v40  ;;  %v543_v11 = vand.u32 4294901760, %v542_v34 }
  0x79   : > { %409 = vperm.xlu0 %1569, %v399_v50  }
  0x7a   : > { %810 = vmatpush.xpose.msrb.mxu0 %v1874_v47  ;;  %875 = vmatpush.xpose.msrb.mxu1 %v1825_v13  ;;  %v400_v13 = vld [vmem:[%s2231_s2 + $0x10] sm:$0xff] }
  0x7b   : > { %1476 = vmatpush.xpose.msrb.mxu3 %v1849_v29  ;;  %414 = vperm.xlu1 %1570, %v400_v13  }
  0x7c   : > { %1460 = vmatpush.xpose.msrb.mxu2 %v1874_v47 }
  0x7d   : > { %653 = vmatmul.f32.gmra.mxu1 %v1993_v37  ;;  %544 = vmatmul.f32.gmra.mxu0 %v543_v11 }
  0x7e   : > { %814 = vmatpush.xpose.msrb.mxu0 %v1884_v54  ;;  %877 = vmatpush.xpose.msrb.mxu1 %v1838_v21  ;;  %v401_v21 = vld [vmem:[%s2231_s2 + $0x18] sm:$0xff] }
  0x7f   : > { %1477 = vmatpush.xpose.msrb.mxu3 %v1859_v36  ;;  %726 = vmatmul.f32.gmra.mxu2 %v540_v49 }
  0x80   : > { %1461 = vmatpush.xpose.msrb.mxu2 %v1884_v54  ;;  %783 = vmatmul.f32.gmra.mxu3 %v541_v10 }
  0x82   : > { %818 = vmatpush.xpose.msrb.mxu0 %v1889_v57  ;;  %879 = vmatpush.xpose.msrb.mxu1 %v1849_v29 }
  0x83   : > { %1478 = vmatpush.xpose.msrb.mxu3 %v1869_v43  ;;  %419 = vperm.xlu1 %1570, %v401_v21  }
  0x84   : > { %1462 = vmatpush.xpose.msrb.mxu2 %v1889_v57 }
  0x85   : > { %657 = vmatmul.f32.gmra.mxu1 %v2012_v26 }
  0x86   : > { %822 = vmatpush.xpose.msrb.mxu0 %v1904_v4  ;;  %881 = vmatpush.xpose.msrb.mxu1 %v1859_v36 }
  0x87   : > { %1479 = vmatpush.xpose.msrb.mxu3 %v1882_v53 }
  0x88   : > { %1463 = vmatpush.xpose.msrb.mxu2 %v1904_v4 }
  0x8a   : > { %826 = vmatpush.xpose.msrb.mxu0 %v1914_v15  ;;  %883 = vmatpush.xpose.msrb.mxu1 %v1869_v43 }
  0x8b   : > { %1480 = vmatpush.xpose.msrb.mxu3 %v1895_v62 }
  0x8c   : > { %1464 = vmatpush.xpose.msrb.mxu2 %v1914_v15 }
  0x8e   : > { %830 = vmatpush.xpose.msrb.mxu0 %v1924_v25  ;;  %885 = vmatpush.xpose.msrb.mxu1 %v1882_v53 }
  0x8f   : > { %1481 = vmatpush.xpose.msrb.mxu3 %v1900_v1 }
  0x90   : > { %1465 = vmatpush.xpose.msrb.mxu2 %v1924_v25 }
  0x92   : > { %834 = vmatpush.xpose.msrb.mxu0 %v1934_v35  ;;  %887 = vmatpush.xpose.msrb.mxu1 %v1895_v62 }
  0x93   : > { %1482 = vmatpush.xpose.msrb.mxu3 %v1909_v8 }
  0x94   : > { %1466 = vmatpush.xpose.msrb.mxu2 %v1934_v35 }
  0x96   : > { %838 = vmatpush.xpose.msrb.mxu0 %v1939_v39  ;;  %889 = vmatpush.xpose.msrb.mxu1 %v1900_v1 }
  0x97   : > { %1483 = vmatpush.xpose.msrb.mxu3 %v1919_v18 }
  0x98   : > { %1467 = vmatpush.xpose.msrb.mxu2 %v1939_v39 }
  0x9a   : > { %842 = vmatpush.xpose.msrb.mxu0 %v1953_v52  ;;  %891 = vmatpush.xpose.msrb.mxu1 %v1909_v8 }
  0x9b   : > { %1484 = vmatpush.xpose.msrb.mxu3 %v1932_v33 }
  0x9c   : > { %1468 = vmatpush.xpose.msrb.mxu2 %v1953_v52 }
  0x9e   : > { %846 = vmatpush.xpose.msrb.mxu0 %v1965_v63  ;;  %893 = vmatpush.xpose.msrb.mxu1 %v1919_v18 }
  0x9f   : > { %1485 = vmatpush.xpose.msrb.mxu3 %v1944_v45 }
  0xa0   : > { %1469 = vmatpush.xpose.msrb.mxu2 %v1965_v63 }
  0xa2   : > { %850 = vmatpush.xpose.msrb.mxu0 %v1971_v6  ;;  %895 = vmatpush.xpose.msrb.mxu1 %v1932_v33 }
  0xa3   : > { %1486 = vmatpush.xpose.msrb.mxu3 %v1951_v51 }
  0xa4   : > { %1470 = vmatpush.xpose.msrb.mxu2 %v1971_v6 }
  0xa5   : > { %852 = vmatmul.f32.vlgmr.msrb.gmra.mxu0 %v1960_v58 }
  0xa6   : > { %897 = vmatpush.xpose.msrb.mxu1 %v1944_v45  ;;  %909 = vmatmul.f32.vlgmr.msrb.gmra.mxu3 %v1993_v37 }
  0xa7   : > { %860 = vmatmul.f32.vlgmr.msrb.gmra.mxu2 %v1993_v37 }
  0xaa   : > { %899 = vmatpush.xpose.msrb.mxu1 %v1951_v51 }
  0xad   : > { %856 = vmatmul.f32.gmra.mxu0 %v1978_v16  ;;  %901 = vmatmul.f32.vlgmr.msrb.gmra.mxu1 %v1960_v58 }
  0xae   : > { %913 = vmatmul.f32.gmra.mxu3 %v2012_v26 }
  0xaf   : > { %864 = vmatmul.f32.gmra.mxu2 %v2012_v26 }
  0xb5   : > { %905 = vmatmul.f32.gmra.mxu1 %v1978_v16 }
  0xe2   : > { %v521_v29 = vpop.f32.mrf.mxu0 }
  0xe3   : > { %v405_v8 = vpop.permute.xlu0 %404 }
  0xe4   : > { %v522_v33 = vadd.f32 %v521_v29, %v405_v8 }
  0xea   : > { %v712_v41 = vpop.f32.mrf.mxu2  ;;  %v646_v43 = vpop.f32.mrf.mxu1 }
  0xeb   : > { %v766_v36 = vpop.f32.mrf.mxu3  ;;  %v529_v47 = vpop.f32.mrf.mxu0  ;;  %v647_v45 = vadd.f32 %v646_v43, %v522_v33 }
  0xec   : > { %v410_v52 = vpop.permute.xlu0 %409 }
  0xed   : > { %v415_v15 = vpop.permute.xlu1 %414  ;;  %v713_v59 = vadd.f32 %v712_v41, %v647_v45  ;;  %v530_v60 = vadd.f32 %v529_v47, %v410_v52 }
  0xef   : > { %v767_v2 = vadd.f32 %v766_v36, %v713_v59 }
  0xf2   : > { %v717_v54 = vpop.f32.mrf.mxu2  ;;  %v650_v57 = vpop.f32.mrf.mxu1 }
  0xf3   : > { %v772_v53 = vpop.f32.mrf.mxu3  ;;  %v537_v62 = vpop.f32.mrf.mxu0  ;;  %v651_v3 = vadd.f32 %v650_v57, %v530_v60 }
  0xf4   : > { %v538_v35 = vadd.f32 %v537_v62, %v415_v15 }
  0xf5   : > { %v420_v56 = vpop.permute.xlu1 %419  ;;  %v718_v22 = vadd.f32 %v717_v54, %v651_v3 }
  0xf7   : > { %v773_v32 = vadd.f32 %v772_v53, %v718_v22 }
  0xfa   : > { %v722_v4 = vpop.f32.mrf.mxu2  ;;  %v654_v18 = vpop.f32.mrf.mxu1 }
  0xfb   : > { %v778_v1 = vpop.f32.mrf.mxu3  ;;  %v545_v25 = vpop.f32.mrf.mxu0  ;;  %v655_v55 = vadd.f32 %v654_v18, %v538_v35 }
  0xfc   : > { %v546_v63 = vadd.f32 %v545_v25, %v420_v56 }
  0xfd   : > { %v723_v61 = vadd.f32 %v722_v4, %v655_v55 }
  0xff   : > { %v779_v5 = vadd.f32 %v778_v1, %v723_v61 }
 0x102   : > { %v727_v51 = vpop.f32.mrf.mxu2  ;;  %v658_v58 = vpop.f32.mrf.mxu1 }
 0x103   : > { %v784_v39 = vpop.f32.mrf.mxu3  ;;  %v659_v6 = vadd.f32 %v658_v58, %v546_v63 }
 0x105   : > { %v728_v24 = vadd.f32 %v727_v51, %v659_v6 }
 0x107   : > { %v785_v37 = vadd.f32 %v784_v39, %v728_v24 }
 0x122   : > { %v853_v0 = vpop.f32.mrf.mxu0 }
 0x123   : > { %v854_v12 = vadd.f32 %v853_v0, %v767_v2 }
 0x129   : > { %v910_v7 = vpop.f32.mrf.mxu3 }
 0x12a   : > { %v861_v14 = vpop.f32.mrf.mxu2  ;;  %v902_v17 = vpop.f32.mrf.mxu1 }
 0x12b   : > { %v862_v16 = vadd.f32 %v861_v14, %v779_v5  ;;  %v903_v23 = vadd.f32 %v902_v17, %v854_v12  ;;  %v857_v30 = vpop.f32.mrf.mxu0 }
 0x12c   : > { %v858_v19 = vadd.f32 %v857_v30, %v773_v32 }
 0x12d   : > { %v911_v27 = vadd.f32 %v910_v7, %v862_v16  ;;  %v917_v28 = vmax.f32 %v903_v23, 0.0 }
 0x12f   : > { %v919_v31 = vmax.f32 %v911_v27, 0.0  ;;  %921 = vst [vmem:[#allocation2 + $0x10] sm:$0xff] %v917_v28 }
 0x131   : > { %923 = vst [vmem:[#allocation2 + $0x18] sm:$0xff] %v919_v31  ;;  %v914_v40 = vpop.f32.mrf.mxu3 }
 0x132   : > { %v865_v38 = vpop.f32.mrf.mxu2  ;;  %v906_v20 = vpop.f32.mrf.mxu1 }
 0x133   : > { %v866_v42 = vadd.f32 %v865_v38, %v785_v37  ;;  %v907_v9 = vadd.f32 %v906_v20, %v858_v19 }
 0x135   : > { %v915_v44 = vadd.f32 %v914_v40, %v866_v42  ;;  %v918_v26 = vmax.f32 %v907_v9, 0.0 }
 0x137   : > { %v920_v46 = vmax.f32 %v915_v44, 0.0  ;;  %922 = vst [vmem:[#allocation2] sm:$0xff] %v918_v26 }
 0x139   : > { %924 = vst [vmem:[#allocation2 + $0x8] sm:$0xff] %v920_v46 }
 0x13a PF: > { %p1445_p2 = scmp.le.s32.totalorder %s1654_s29, 0 }
 0x13c   : > { %928 = sbr.rel (%p1445_p2) target bundleno = 521 (0x209), region = 56 }
 0x141   : > { %v936_v48 = vld [vmem:[#allocation2 + $0x8] sm:$0xff]  ;;  %v935_v49 = vld [vmem:[#allocation2 + $0x18] sm:$0xff]  ;;  %v934_v10 = vld [vmem:[#allocation2] sm:$0xff]  ;;  %vm961_vm1 = vcmask 261120   ;;  %v1673_v36 = vmov 0  }
 0x142   : > { %v2087_v34 = vand.u32 4294901760, %v936_v48  ;;  %v2089_v50 = vand.u32 4294901760, %v935_v49  ;;  %v2091_v11 = vand.u32 4294901760, %v934_v10  ;;  %v933_v13 = vld [vmem:[#allocation2 + $0x10] sm:$0xff]  ;;  %v932_v29 = vld [vmem:[%s1798_s17 + $0x18] sm:$0xff]  ;;  %1572 = vset.pattern.permute.xlu1 %v1673_v36  ;;  %1571 = vset.pattern.permute.xlu0 %v1673_v36  ;;  %v929_v53 = vld [vmem:[%s1798_s17] sm:$0xff] }
 0x143   : > { %v931_v21 = vld [vmem:[%s1798_s17 + $0x10] sm:$0xff]  ;;  %v2095_v41 = vand.u32 4294901760, %v933_v13  ;;  %v972_v47 = vsel %vm961_vm1, %v932_v29, 0  ;;  %v930_v57 = vld [vmem:[%s1798_s17 + $0x8] sm:$0xff]  ;;  %v963_v25 = vsel %vm961_vm1, %v929_v53, 0  ;;  %v937_v52 = vld [vmem:[%s1803_s12] sm:$0xff] }
 0x144   : > { %v969_v43 = vsel %vm961_vm1, %v931_v21, 0  ;;  %v939_v54 = vld [vmem:[%s1803_s12 + $0x10] sm:$0xff]  ;;  %1487 = vmatpush.msra.mxu2 %v2087_v34  ;;  %v1040_v62 = vsub.f32 %v936_v48, %v2087_v34  ;;  %v1046_v4 = vsub.f32 %v935_v49, %v2089_v50  ;;  %v1052_v8 = vsub.f32 %v934_v10, %v2091_v11  ;;  %987 = vmatpush.msra.mxu0 %v2087_v34  ;;  %v940_v37 = vld [vmem:[%s1803_s12 + $0x18] sm:$0xff]  ;;  %v938_v38 = vld [vmem:[%s1803_s12 + $0x8] sm:$0xff] }
 0x145   : > { %v2104_v1 = vand.u32 4294901760, %v969_v43  ;;  %v2110_v15 = vsub.f32 %v933_v13, %v2095_v41  ;;  %v2112_v18 = vand.u32 4294901760, %v972_v47  ;;  %953 = vperm.xlu1 %1572, %v939_v54   ;;  %v966_v33 = vsel %vm961_vm1, %v930_v57, 0  ;;  %943 = vperm.xlu0 %1571, %v937_v52  }
 0x146   : > { %1488 = vmatpush.msra.mxu2 %v2089_v50  ;;  %v1041_v35 = vand.u32 4294901760, %v1040_v62  ;;  %v1047_v45 = vand.u32 4294901760, %v1046_v4  ;;  %v1053_v51 = vand.u32 4294901760, %v1052_v8  ;;  %989 = vmatpush.msra.mxu0 %v2089_v50  ;;  %v2126_v58 = vand.u32 4294901760, %v963_v25 }
 0x147   : > { %v2118_v39 = vsub.f32 %v969_v43, %v2104_v1  ;;  %v1059_v55 = vand.u32 4294901760, %v2110_v15  ;;  %v2124_v56 = vsub.f32 %v972_v47, %v2112_v18  ;;  %v2128_v59 = vand.u32 4294901760, %v966_v33 }
 0x148   : > { %1489 = vmatpush.msra.mxu2 %v2091_v11  ;;  %v1042_v60 = vsub.f32 %v1040_v62, %v1041_v35  ;;  %v1048_v63 = vsub.f32 %v1046_v4, %v1047_v45  ;;  %v1054_v0 = vsub.f32 %v1052_v8, %v1053_v51  ;;  %991 = vmatpush.msra.mxu0 %v2091_v11 }
 0x149   : > { %v1012_v61 = vand.u32 4294901760, %v2118_v39  ;;  %v1060_v2 = vsub.f32 %v2110_v15, %v1059_v55  ;;  %v995_v3 = vsub.f32 %v963_v25, %v2126_v58  ;;  %v1003_v5 = vsub.f32 %v966_v33, %v2128_v59 }
 0x14a   : > { %1490 = vmatpush.msra.mxu2 %v2095_v41  ;;  %v1043_v6 = vand.u32 4294901760, %v1042_v60  ;;  %v1049_v12 = vand.u32 4294901760, %v1048_v63  ;;  %v1020_v14 = vand.u32 4294901760, %v2124_v56  ;;  %993 = vmatpush.msra.mxu0 %v2095_v41  ;;  %v1055_v22 = vand.u32 4294901760, %v1054_v0 }
 0x14b   : > { %v1013_v7 = vsub.f32 %v2118_v39, %v1012_v61  ;;  %v996_v16 = vand.u32 4294901760, %v995_v3  ;;  %v1004_v24 = vand.u32 4294901760, %v1003_v5  ;;  %v1061_v27 = vand.u32 4294901760, %v1060_v2 }
 0x14c   : > { %1094 = vmatpush.msrb.mxu2 %v1040_v62  ;;  %1185 = vmatpush.msrb.mxu0 %v1041_v35  ;;  %v1021_v28 = vsub.f32 %v2124_v56, %v1020_v14 }
 0x14d   : > { %1491 = vmatpush.msra.mxu3 %v1043_v6  ;;  %v1014_v17 = vand.u32 4294901760, %v1013_v7  ;;  %1044 = vmatpush.msra.mxu1 %v1043_v6  ;;  %v997_v23 = vsub.f32 %v995_v3, %v996_v16  ;;  %v1005_v31 = vsub.f32 %v1003_v5, %v1004_v24 }
 0x14e   : > { %1097 = vmatpush.msrb.mxu2 %v1046_v4  ;;  %1189 = vmatpush.msrb.mxu0 %v1047_v45  ;;  %v1022_v32 = vand.u32 4294901760, %v1021_v28 }
 0x14f   : > { %1015 = vmatmul.f32.vlgmr.msra.gmra.mxu2 %v1014_v17  ;;  %1492 = vmatpush.msra.mxu3 %v1049_v12  ;;  %v998_v30 = vand.u32 4294901760, %v997_v23  ;;  %v1006_v19 = vand.u32 4294901760, %v1005_v31 }
 0x150   : > { %1050 = vmatpush.msra.mxu1 %v1049_v12  ;;  %1100 = vmatpush.msrb.mxu2 %v1052_v8 }
 0x151   : > { %1493 = vmatpush.msra.mxu3 %v1055_v22  ;;  %1193 = vmatpush.msrb.mxu0 %v1053_v51 }
 0x152   : > { %1056 = vmatpush.msra.mxu1 %v1055_v22  ;;  %999 = vmatmul.f32.vlgmr.msra.gmra.mxu0 %v998_v30 }
 0x153   : > { %1494 = vmatpush.msra.mxu3 %v1061_v27  ;;  %1103 = vmatpush.msrb.mxu2 %v2110_v15 }
 0x154   : > { %1072 = vmatmul.f32.vlgmr.msra.gmra.mxu3 %v2104_v1  ;;  %1062 = vmatpush.msra.mxu1 %v1061_v27 }
 0x155   : > { %1138 = vmatpush.msrb.mxu3 %v2087_v34  ;;  %1064 = vmatmul.f32.vlgmr.msra.gmra.mxu1 %v2126_v58 }
 0x156   : > { %1228 = vmatpush.msrb.mxu1 %v2087_v34  ;;  %1197 = vmatpush.msrb.mxu0 %v1059_v55 }
 0x157   : > { %1023 = vmatmul.f32.gmra.mxu2 %v1022_v32  ;;  %1140 = vmatpush.msrb.mxu3 %v2089_v50 }
 0x158   : > { %1230 = vmatpush.msrb.mxu1 %v2089_v50  ;;  %958 = vperm.xlu1 %1572, %v940_v37  }
 0x159   : > { %1142 = vmatpush.msrb.mxu3 %v2091_v11  ;;  %948 = vperm.xlu0 %1571, %v938_v38  }
 0x15a   : > { %1007 = vmatmul.f32.gmra.mxu0 %v1006_v19  ;;  %1232 = vmatpush.msrb.mxu1 %v2091_v11 }
 0x15b   : > { %1144 = vmatpush.msrb.mxu3 %v2095_v41 }
 0x15c   : > { %1076 = vmatmul.f32.gmra.mxu3 %v2112_v18  ;;  %1234 = vmatpush.msrb.mxu1 %v2095_v41 }
 0x15d   : > { %1068 = vmatmul.f32.gmra.mxu1 %v2128_v59 }
 0x15f   : > { %1106 = vmatmul.f32.vlgmr.msrb.gmra.mxu2 %v995_v3 }
 0x162   : > { %1199 = vmatmul.f32.vlgmr.msrb.gmra.mxu0 %v2126_v58 }
 0x164   : > { %1148 = vmatmul.f32.vlgmr.msrb.gmra.mxu3 %v996_v16 }
 0x165   : > { %1236 = vmatmul.f32.vlgmr.msrb.gmra.mxu1 %v2126_v58 }
 0x167   : > { %1111 = vmatmul.f32.gmra.mxu2 %v1003_v5 }
 0x16a   : > { %1203 = vmatmul.f32.gmra.mxu0 %v2128_v59 }
 0x16c   : > { %1154 = vmatmul.f32.gmra.mxu3 %v1004_v24 }
 0x16d   : > { %1240 = vmatmul.f32.gmra.mxu1 %v2128_v59 }
 0x16f   : > { %1116 = vmatmul.f32.gmra.mxu2 %v2118_v39 }
 0x172   : > { %1207 = vmatmul.f32.gmra.mxu0 %v2104_v1 }
 0x174   : > { %1160 = vmatmul.f32.gmra.mxu3 %v1012_v61 }
 0x175   : > { %1244 = vmatmul.f32.gmra.mxu1 %v2104_v1 }
 0x177   : > { %1121 = vmatmul.f32.gmra.mxu2 %v2124_v56 }
 0x17a   : > { %1211 = vmatmul.f32.gmra.mxu0 %v2112_v18 }
 0x17c   : > { %1166 = vmatmul.f32.gmra.mxu3 %v1020_v14 }
 0x17d   : > { %1248 = vmatmul.f32.gmra.mxu1 %v2112_v18 }
 0x1b7   : > { %v944_v48 = vpop.permute.xlu0 %943  ;;  %v954_v54 = vpop.permute.xlu1 %953 }
 0x1ca   : > { %v959_v52 = vpop.permute.xlu1 %958 }
 0x1cb   : > { %v949_v21 = vpop.permute.xlu0 %948 }
 0x1cf   : > { %v1000_v40 = vpop.f32.mrf.mxu0 }
 0x1d0   : > { %v1001_v10 = vadd.f32 %v1000_v40, %v944_v48 }
 0x1d2   : > { %v1016_v42 = vpop.f32.mrf.mxu2  ;;  %v1065_v20 = vpop.f32.mrf.mxu1 }
 0x1d3   : > { %v1066_v13 = vadd.f32 %v1065_v20, %v1001_v10  ;;  %v1017_v25 = vadd.f32 %v1016_v42, %v954_v54 }
 0x1d7   : > { %v1073_v9 = vpop.f32.mrf.mxu3  ;;  %v1008_v44 = vpop.f32.mrf.mxu0 }
 0x1d8   : > { %v1009_v41 = vadd.f32 %v1008_v44, %v949_v21  ;;  %v1074_v45 = vadd.f32 %v1073_v9, %v1017_v25 }
 0x1da   : > { %v1024_v26 = vpop.f32.mrf.mxu2  ;;  %v1069_v46 = vpop.f32.mrf.mxu1 }
 0x1db   : > { %v1070_v62 = vadd.f32 %v1069_v46, %v1009_v41  ;;  %v1025_v61 = vadd.f32 %v1024_v26, %v959_v52 }
 0x1df   : > { %v1077_v49 = vpop.f32.mrf.mxu3  ;;  %v1200_v34 = vpop.f32.mrf.mxu0 }
 0x1e0   : > { %v1078_v3 = vadd.f32 %v1077_v49, %v1025_v61 }
 0x1e2   : > { %v1107_v50 = vpop.f32.mrf.mxu2  ;;  %v1237_v11 = vpop.f32.mrf.mxu1 }
 0x1e3   : > { %v1108_v29 = vadd.f32 %v1107_v50, %v1066_v13 }
 0x1e7   : > { %v1149_v36 = vpop.f32.mrf.mxu3  ;;  %v1204_v57 = vpop.f32.mrf.mxu0 }
 0x1e8   : > { %v1150_v43 = vadd.f32 %v1149_v36, %v1108_v29 }
 0x1ea   : > { %v1112_v47 = vpop.f32.mrf.mxu2  ;;  %v1201_v53 = vadd.f32 %v1200_v34, %v1150_v43  ;;  %v1241_v4 = vpop.f32.mrf.mxu1 }
 0x1eb   : > { %v1113_v8 = vadd.f32 %v1112_v47, %v1070_v62 }
 0x1ec   : > { %v1238_v1 = vadd.f32 %v1237_v11, %v1201_v53 }
 0x1ee   : > { %v1252_v15 = vmax.f32 %v1238_v1, 0.0 }
 0x1ef   : > { %v1155_v18 = vpop.f32.mrf.mxu3  ;;  %v1208_v55 = vpop.f32.mrf.mxu0 }
 0x1f0   : > { %1256 = vst [vmem:[#allocation2 + $0x10] sm:$0xff] %v1252_v15  ;;  %v1156_v33 = vadd.f32 %v1155_v18, %v1113_v8 }
 0x1f2   : > { %v1117_v35 = vpop.f32.mrf.mxu2  ;;  %v1205_v39 = vadd.f32 %v1204_v57, %v1156_v33  ;;  %v1245_v60 = vpop.f32.mrf.mxu1 }
 0x1f3   : > { %v1118_v56 = vadd.f32 %v1117_v35, %v1074_v45 }
 0x1f4   : > { %v1242_v51 = vadd.f32 %v1241_v4, %v1205_v39 }
 0x1f6   : > { %v1253_v58 = vmax.f32 %v1242_v51, 0.0 }
 0x1f7   : > { %v1161_v59 = vpop.f32.mrf.mxu3  ;;  %v1212_v14 = vpop.f32.mrf.mxu0 }
 0x1f8   : > { %1257 = vst [vmem:[#allocation2] sm:$0xff] %v1253_v58  ;;  %v1162_v63 = vadd.f32 %v1161_v59, %v1118_v56 }
 0x1fa   : > { %v1209_v0 = vadd.f32 %v1208_v55, %v1162_v63  ;;  %v1122_v2 = vpop.f32.mrf.mxu2  ;;  %v1249_v17 = vpop.f32.mrf.mxu1 }
 0x1fb   : > { %v1123_v6 = vadd.f32 %v1122_v2, %v1078_v3 }
 0x1fc   : > { %v1246_v5 = vadd.f32 %v1245_v60, %v1209_v0 }
 0x1fe   : > { %v1254_v7 = vmax.f32 %v1246_v5, 0.0 }
 0x1ff   : > { %v1167_v12 = vpop.f32.mrf.mxu3 }
 0x200   : > { %1258 = vst [vmem:[#allocation2 + $0x18] sm:$0xff] %v1254_v7  ;;  %v1168_v16 = vadd.f32 %v1167_v12, %v1123_v6 }
 0x202   : > { %v1213_v22 = vadd.f32 %v1212_v14, %v1168_v16 }
 0x204   : > { %v1250_v23 = vadd.f32 %v1249_v17, %v1213_v22 }
 0x206   : > { %v1255_v24 = vmax.f32 %v1250_v23, 0.0 }
 0x208   : > { %1259 = vst [vmem:[#allocation2 + $0x8] sm:$0xff] %v1255_v24 }
 0x209 PF: > { %p1446_p4 = scmp.ne.s32.totalorder %s1654_s29, 3 }
 0x20b   : > { %1263 = sbr.rel (%p1446_p4) target bundleno = 676 (0x2a4), region = 60 }
 0x210   : > { %v1270_v27 = vld [vmem:[%s2234_s5 + $0x10] sm:$0xff]  ;;  %v1268_v28 = vld [vmem:[%s2234_s5] sm:$0xff]  ;;  %v1674_v30 = vmov 0   ;;  %v1271_v32 = vld [vmem:[%s2234_s5 + $0x18] sm:$0xff] }
 0x211   : > { %1574 = vset.pattern.permute.xlu1 %v1674_v30  ;;  %1573 = vset.pattern.permute.xlu0 %v1674_v30  ;;  %v1305_v31 = vld [vmem:[#allocation3] sm:$0x1]  ;;  %v1269_v37 = vld [vmem:[%s2234_s5 + $0x8] sm:$0xff]  ;;  %v1264_v40 = vld [vmem:[#allocation2 + $0x10] sm:$0xff] }
 0x212   : > { %1284 = vperm.xlu1 %1574, %v1270_v27   ;;  %1274 = vperm.xlu0 %1573, %v1268_v28   ;;  %v1265_v42 = vld [vmem:[#allocation2] sm:$0xff]  ;;  %v1266_v20 = vld [vmem:[#allocation2 + $0x18] sm:$0xff]  ;;  %v1267_v48 = vld [vmem:[#allocation2 + $0x8] sm:$0xff] }
 0x213   : > { %1575 = vset.pattern.permute.xlu2 %v1674_v30 }
 0x214   : > { %1308 = vperm.xlu2 %1575, %v1305_v31  }
 0x21a   : > { %1289 = vperm.xlu1 %1574, %v1271_v32   ;;  %1279 = vperm.xlu0 %1573, %v1269_v37  }
 0x26e   : > { %v1309_v36 = vpop.permute.xlu2 %1308 }
 0x26f   : > { %v1311_v47 = vperm.slane %v1309_v36, 0 }
 0x284   : > { %v1285_v19 = vpop.permute.xlu1 %1284  ;;  %v1275_v38 = vpop.permute.xlu0 %1274 }
 0x285   : > { %v1292_v44 = vmul.f32 %v1275_v38, %v1264_v40  ;;  %v1294_v49 = vmul.f32 %v1285_v19, %v1266_v20 }
 0x28c   : > { %v1280_v9 = vpop.permute.xlu0 %1279  ;;  %v1290_v46 = vpop.permute.xlu1 %1289 }
 0x28d   : > { %v1293_v26 = vmul.f32 %v1280_v9, %v1265_v42  ;;  %v1295_v34 = vmul.f32 %v1290_v46, %v1267_v48 }
 0x28f   : > { %v1296_v10 = vadd.f32 %v1293_v26, %v1292_v44 }
 0x291   : > { %v1297_v50 = vadd.f32 %v1296_v10, %v1294_v49 }
 0x293   : > { %v1298_v11 = vadd.f32 %v1297_v50, %v1295_v34 }
 0x295   : > { %v1299_v13 = vrot.slane %v1298_v11, 4 }
 0x297   : > { %v1300_v21 = vadd.f32 %v1299_v13, %v1298_v11 }
 0x299   : > { %v1301_v29 = vrot.slane %v1300_v21, 2 }
 0x29b   : > { %v1302_v41 = vadd.f32 %v1301_v29, %v1300_v21 }
 0x29d   : > { %v1303_v43 = vrot.slane %v1302_v41, 1 }
 0x29f   : > { %v1304_v53 = vadd.f32 %v1303_v43, %v1302_v41 }
 0x2a1   : > { %v1312_v54 = vadd.f32 %v1311_v47, %v1304_v53 }
 0x2a3   : > { %1313 = vst [vmem:[%s1807_s9] sm:$0x1] %v1312_v54 }
 0x2a4 PF: > { %s1323_s19 = scalar_lea.hbm %s2236_s7, %s1658_s30  ;;  %s1325_s21 = sshll.u32 %s1807_s9, 4  ;;  %s1326_s21 = int_to_ptr.vmem [resolvable:$true] %s1325_s21 }
 0x2a5   : > { %s1327_s22 = sshll.u32 %s1323_s19, 4  ;;  %s2245_s23 = sand.u32 1, %s1646_s27   ;;  %s1328_s22 = int_to_ptr.hbm [resolvable:$true] %s1327_s22 }
 0x2a6   : > { %s1315_s12 = scalar_lea.sflag [#allocation5], %s2245_s23  ;;  %s1590_s17 = sshra.s32 %s1328_s22, 4  ;;  %s1591_s17 = int_to_ptr.hbm [resolvable:$true] %s1590_s17 }
 0x2a7   : > { %s1592_s24 = scalar_lea.hbm %s1591_s17, 1  ;;  %s1596_s11 = scalar_lea.hbm %s2236_s7, 2 }
 0x2a8   : > { %p1593_p5 = scmp.ne.s32.totalorder %s1591_s17, %s1592_s24  ;;  %p1597_p8 = scmp.lt.s32.totalorder %s1591_s17, %s2236_s7 }
 0x2a9   : > { %p1598_p10 = scmp.lt.s32.totalorder %s1596_s11, %s1592_s24 }
 0x2aa   : > { %p1594_p6 = pnand %p1593_p5, %p1767_p3 }
 0x2ab   : > { %p1599_p11 = por %p1598_p10, %p1597_p8 }
 0x2ac   : > { %p1595_p7 = pneg %p1594_p6 }
 0x2ae   : > { %p1600_p12 = pnand %p1599_p11, %p1595_p7 }
 0x2b0   : > { %1603 = shalt.err (!%p1600_p12)
}
 0x2b1   : > { %1495 = dma.vmem_to_hbm [thread:$0]  (%p1767_p3), %s1326_s21, 16, %s1328_s22, %s1315_s12  }
 0x2b2 PF: > { %p1501_p13 = scmp.ge.s32.totalorder %s1670_s10, 2  ;;  %s1339_s30 = sand.u32 1, %s1642_s26  }
 0x2b3   : > { %s1340_s9 = scalar_lea.sflag [#allocation5], %s1339_s30 }
 0x2b4   : > { %p1498_p0 = pnand %p1501_p13, %p1777_p9 }
 0x2b6   : > { %p1499_p1 = pneg %p1498_p0 }
 0x2b8   : > { %1637 = dma.done.wait (%p1499_p1), %s1340_s9, 16  }
 0x2b9   : > { %1639 = vsyncadd (%p1499_p1), %s1340_s9, 4294967280  ;;  %s22_s10 = sadd.s32 1, %s1670_s10   ;;  %s2246_s30 = sld [smem:[#allocation7_spill]] }
 0x2ba   : > { %p19_p2 = scmp.ge.s32.totalorder %s22_s10, 10   ;;  %s2247_s14 = sld [smem:[#allocation8_spill]] }
 0x2bb   : > { %s2248_s9 = sld [smem:[#allocation9_spill]]  ;;  %s2249_s26 = smov %s1646_s27 }
 0x2bc   : > { %s2250_s27 = smov %s1650_s28  ;;  %s2251_s28 = smov %s1785_s18 }
 0x2bd   : > { %s2252_s29 = smov %s1662_s8  ;;  %21 = sbr.rel (!%p19_p2) target bundleno = 8 (0x8), region = 101 }
 0x2c0   : > { %s2253_s8 = smov %s2247_s14 }
 0x2c2   :  { %1345 = vsyncpa [#allocation5], 1 }
 0x2c3   :  { %1347 = vsyncpa [#allocation5 + $0x1], 1 }

</bundles_post_ra>
